<compile_context>
chip_gen: v6e
topology: v6e:2x2x1
jax: 0.10.0
libtpu: 0.0.40
codegen_flags: <defaults>
</compile_context>

<pallas_src>
import jax
import jax.numpy as jnp
from jax.experimental import pallas as pl
from jax.experimental.pallas import tpu as pltpu


# ----------------------------------------------------------------------------
# Kernel
# ----------------------------------------------------------------------------
def encoder_kernel(x_ref, wf_ref, vec_ref, eps_ref, zsum_ref, klsum_ref,
                   acc_ref):
    # grid = (nt, kt); k (reduction over input features) is the innermost axis.
    k = pl.program_id(1)
    tk = wf_ref.shape[0]                 # K tile (rows of the fused weight blk)
    tn = wf_ref.shape[1] // 2            # N tile (cols [0:tn]=w1, [tn:2tn]=w3)

    @pl.when(k == 0)
    def _():
        acc_ref[...] = jnp.zeros_like(acc_ref)

    # x is fully VMEM-resident; slice the current K chunk (bf16, lane-aligned).
    start = pl.multiple_of(k * tk, tk)
    xk = x_ref[:, pl.ds(start, tk)]                       # (B, tk) bf16

    # Fused matmul against the contiguous [w1_tile | w3_tile] block.
    acc_ref[...] += jnp.dot(xk, wf_ref[...],
                            preferred_element_type=jnp.float32)

    @pl.when(k == pl.num_programs(1) - 1)
    def _():
        acc = acc_ref[...]                                # (B, 2*tn) f32
        vec = vec_ref[...]                                # (5, tn) f32
        b1 = vec[0:1, :]
        b3 = vec[1:2, :]
        circ = vec[2:3, :]
        a = vec[3:4, :]
        m = vec[4:5, :]                                   # 1.0 valid / 0.0 pad

        xy1 = acc[:, :tn] + b1                            # Linear1 output
        log_sigma = acc[:, tn:] + b3                      # Linear3 output
        sigma = jnp.exp(log_sigma)
        mu = circ * xy1 + a
        z = mu + sigma * eps_ref[...]
        # torch.log(sigma) == log_sigma exactly (sigma = exp(log_sigma)).
        kl = jnp.sum(m * (sigma * sigma + mu * mu - log_sigma - 0.5))
        zsum = jnp.sum(m * z)
        zsum_ref[...] = jnp.broadcast_to(zsum, zsum_ref.shape).astype(
            jnp.float32)
        klsum_ref[...] = jnp.broadcast_to(kl, klsum_ref.shape).astype(
            jnp.float32)


# ----------------------------------------------------------------------------
# One-time parameter preparation (re-layout, pad, fuse, cast)
# ----------------------------------------------------------------------------
def _round_up(v, m):
    return ((v + m - 1) // m) * m


def _vmem_capacity_bytes():
    try:
        return int(pltpu.get_tpu_info().vmem_capacity_bytes)
    except Exception:
        return 128 << 20                      # v5e/v6e-class default


def choose_tiles(K, N, vmem_cap_bytes):
    """Pick (tk, tn) so the double-buffered bf16 weight stream fills most of
    VMEM (~28 MiB double-buffered on 64 MiB parts, ~56 MiB on 128 MiB parts),
    while keeping nt >= 2 so the 'parallel' N axis spans both v7x cores."""
    n_full = _round_up(N, 128)
    tn = _round_up(max(N // 2, 1), 128) if n_full >= 256 else n_full
    budget = (28 << 20) if vmem_cap_bytes <= (64 << 20) else (56 << 20)
    # double-buffered bf16 weight bytes = 2 * tk * (2*tn) * 2 = 8*tk*tn
    tk = (budget // (8 * tn)) // 128 * 128
    tk = max(128, min(tk, _round_up(K, 128)))
    return tk, tn


def prepare_params(params, *, tk=None, tn=None):
    """One-time parameter re-layout.

    params holds PyTorch-convention (out, in) weights and 1-D vectors.
    Produces:
      wf   : (nt, kt, tk, 2*tn) bf16 — block (j, k) is the CONTIGUOUS
             [w1_tile | w3_tile] for N-tile j, K-tile k.
      vecs : (5, Np) f32 — rows are [b1, b3, circ, a, mask].
    """
    N, K = params["w1"].shape
    if tk is None or tn is None:
        atk, atn = choose_tiles(K, N, _vmem_capacity_bytes())
        tk = atk if tk is None else tk
        tn = atn if tn is None else tn
    assert tk % 128 == 0 and tn % 128 == 0

    Kp = _round_up(K, tk)
    Np = _round_up(N, tn)
    kt = Kp // tk
    nt = Np // tn

    def pad_w(w):                          # (N, K) -> (Kp, Np), zero pad
        return jnp.pad(w.T, ((0, Kp - K), (0, Np - N)))

    # (Kp, Np) -> (nt, kt, tk, tn); then concat w1|w3 on the last axis so each
    # (tk, 2*tn) grid block is a single contiguous run in HBM.
    def blockize(w):
        return pad_w(w).reshape(kt, tk, nt, tn).transpose(2, 0, 1, 3)

    wf = jnp.concatenate([blockize(params["w1"]), blockize(params["w3"])],
                         axis=-1).astype(jnp.bfloat16)    # (nt, kt, tk, 2*tn)

    def pad_v(v):
        return jnp.pad(v.astype(jnp.float32), (0, Np - N))

    mask = jnp.pad(jnp.ones((N,), jnp.float32), (0, Np - N))
    vecs = jnp.stack([pad_v(params["b1"]), pad_v(params["b3"]),
                      pad_v(params["circ"]), pad_v(params["a"]), mask],
                     axis=0)                              # (5, Np) f32

    return {
        "wf": wf, "vecs": vecs,
        "n_true": N, "k_true": K, "kp": Kp, "np": Np,
        "tk": tk, "tn": tn, "nt": nt, "kt": kt,
    }


def _vmem_limit_bytes(B, Kp, tk, tn):
    """VMEM budget from actual sublane-padded buffer footprints."""
    b_bf16 = _round_up(B, 16)              # bf16 rows pad to 16 sublanes
    b_f32 = _round_up(B, 8)                # f32 rows pad to 8 sublanes
    x_bytes = b_bf16 * Kp * 2              # resident x (bf16)
    w_bytes = tk * 2 * tn * 2              # fused weight tile (bf16)
    eps_bytes = b_f32 * tn * 4
    vec_bytes = 8 * tn * 4                 # (5, tn) f32 -> 8 sublanes
    acc_bytes = b_f32 * 2 * tn * 4         # scratch accumulator (single buf)
    out_bytes = 8 * 128 * 4                # each tiny output block
    est = (2 * x_bytes            # x double-buffered (constant index_map, but
                                  # budget for 2 rather than rely on Buffered(1))
           + 2 * w_bytes          # double-buffered weight stream
           + 2 * eps_bytes + 2 * vec_bytes
           + acc_bytes
           + 2 * 2 * out_bytes)
    cap_phys = _vmem_capacity_bytes()
    # 64 MiB parts (v7x): cap at 56 MiB to leave compiler-scratch headroom.
    # 128 MiB parts (v5e/v6e): allow up to 112 MiB.
    cap = (56 << 20) if cap_phys <= (64 << 20) else (112 << 20)
    return int(min(max(est + (4 << 20), 16 << 20), cap))


# ----------------------------------------------------------------------------
# Forward wrapper
# ----------------------------------------------------------------------------
def encoder_forward(x, prep, eps):
    """x: (B, D_in) f32, eps: (B, N) f32.  Returns (z_scalar, kl_scalar)."""
    B, K = x.shape
    assert K == prep["k_true"] and eps.shape == (B, prep["n_true"])
    Kp, Np = prep["kp"], prep["np"]
    tk, tn, nt, kt = prep["tk"], prep["tn"], prep["nt"], prep["kt"]

    # Per-call padding of the (small) activations; cast x to bf16 once here.
    xp = jnp.pad(x, ((0, 0), (0, Kp - K))).astype(jnp.bfloat16)
    epsp = jnp.pad(eps, ((0, 0), (0, Np - prep["n_true"])))

    vmem_limit = _vmem_limit_bytes(B, Kp, tk, tn)

    zsum, klsum = pl.pallas_call(
        encoder_kernel,
        out_shape=(jax.ShapeDtypeStruct((1, nt * 128), jnp.float32),
                   jax.ShapeDtypeStruct((1, nt * 128), jnp.float32)),
        grid_spec=pltpu.PrefetchScalarGridSpec(
            num_scalar_prefetch=0,
            grid=(nt, kt),
            in_specs=[
                # x: fully resident in VMEM, constant block index.
                pl.BlockSpec((B, Kp), lambda j, k: (0, 0)),
                # fused weights: one contiguous (tk, 2*tn) block per grid step.
                pl.BlockSpec((None, None, tk, 2 * tn),
                             lambda j, k: (j, k, 0, 0)),
                # fused per-N-tile vectors [b1, b3, circ, a, mask].
                pl.BlockSpec((5, tn), lambda j, k: (0, j)),
                # reparameterization noise.
                pl.BlockSpec((B, tn), lambda j, k: (0, j)),
            ],
            out_specs=[pl.BlockSpec((1, 128), lambda j, k: (0, j)),
                       pl.BlockSpec((1, 128), lambda j, k: (0, j))],
            scratch_shapes=[pltpu.VMEM((B, 2 * tn), jnp.float32)],
        ),
        compiler_params=pltpu.CompilerParams(
            dimension_semantics=("parallel", "arbitrary"),
            vmem_limit_bytes=vmem_limit),
    )(xp, prep["wf"], prep["vecs"], epsp)

    # Per-N-tile partials -> global scalars.
    z_parts = zsum.reshape(nt, 128)[:, 0]
    kl_parts = klsum.reshape(nt, 128)[:, 0]
    z = jnp.sum(z_parts) / (B * prep["n_true"])
    kl = jnp.sum(kl_parts)
    return z, kl


# ----------------------------------------------------------------------------
# Pure-JAX reference (mirrors the kernel's bf16-in / f32-acc numerics)
# ----------------------------------------------------------------------------
def reference_forward(x, params, eps):
    xb = x.astype(jnp.bfloat16)
    w1b = params["w1"].astype(jnp.bfloat16)
    w3b = params["w3"].astype(jnp.bfloat16)
    xy1 = jnp.dot(xb, w1b.T, preferred_element_type=jnp.float32) + params["b1"]
    log_sigma = (jnp.dot(xb, w3b.T, preferred_element_type=jnp.float32)
                 + params["b3"])
    sigma = jnp.exp(log_sigma)
    mu = params["circ"] * xy1 + params["a"]
    z = mu + sigma * eps
    kl = jnp.sum(sigma ** 2 + mu ** 2 - jnp.log(sigma) - 0.5)
    return jnp.mean(z), kl


if __name__ == "__main__":
    # Small surrogates for the module's fixed sizes, deliberately NOT
    # tile-aligned (the real sizes D_in = 195*179*3 = 104715, N = 3500 aren't
    # either) so the K/N padding + KL mask path is exercised.  Small explicit
    # tiles force kt > 1 (multi-step K accumulation) and nt = 2 (parallel N
    # axis); at real sizes choose_tiles() picks e.g. tk=2048/tn=1792 on a
    # 64 MiB-VMEM part and tk=4096/tn=1792 on a 128 MiB part.
    B, D_IN, N = 2, 500, 200
    TK, TN = 128, 128

    key = jax.random.PRNGKey(0)
    kx, kw1, kb1, kw3, kb3, keps = jax.random.split(key, 6)

    scale = 1.0 / jnp.sqrt(D_IN)
    params = {
        "w1": jax.random.normal(kw1, (N, D_IN), jnp.float32) * scale,  # (out,in)
        "b1": jax.random.normal(kb1, (N,), jnp.float32) * 0.01,
        "w3": jax.random.normal(kw3, (N, D_IN), jnp.float32) * scale,
        "b3": jax.random.normal(kb3, (N,), jnp.float32) * 0.01,
        "circ": jnp.ones((N,), jnp.float32),   # as in __init__
        "a": jnp.zeros((N,), jnp.float32),
    }

    x = jax.random.normal(kx, (B, D_IN), jnp.float32)
    # Reparameterization noise (N(0,1)) generated outside for determinism.
    eps = jax.random.normal(keps, (B, N), jnp.float32)

    prep = prepare_params(params, tk=TK, tn=TN)  # one-time layout/pad/bf16 cast
    z, kl = encoder_forward(x, prep, eps)
    jax.block_until_ready((z, kl))

    z_ref, kl_ref = reference_forward(x, params, eps)
    assert jnp.allclose(z, z_ref, rtol=2e-3, atol=2e-3), (z, z_ref)
    assert jnp.allclose(kl, kl_ref, rtol=2e-3, atol=1e-1), (kl, kl_ref)

    print("KERNEL_OK")
</pallas_src>

<mosaic_0001>
module attributes {stable_mosaic.version = 11 : i64} {
  func.func @encoder_kernel(%arg0: i32, %arg1: i32, %arg2: memref<2x512xbf16, #tpu.memory_space<vmem>>, %arg3: memref<1x1x128x256xbf16, #tpu.memory_space<vmem>>, %arg4: memref<5x128xf32, #tpu.memory_space<vmem>>, %arg5: memref<2x128xf32, #tpu.memory_space<vmem>>, %arg6: memref<1x128xf32, #tpu.memory_space<vmem>>, %arg7: memref<1x128xf32, #tpu.memory_space<vmem>>, %arg8: memref<2x256xf32, #tpu.memory_space<vmem>>) attributes {dimension_semantics = [#tpu.dimension_semantics<parallel>, #tpu.dimension_semantics<arbitrary>], iteration_bounds = array<i64: 2, 4>, scalar_prefetch = 0 : i64, scratch_operands = 1 : i64, tpu.core_type = #tpu.core_type<tc>, window_params = [{pipeline_mode = #tpu.pipeline_mode<synchronous>, transform_indices = @transform_0, window_bounds = array<i64: 2, 512>}, {transform_indices = @transform_1, window_bounds = array<i64: 1, 1, 128, 256>}, {transform_indices = @transform_2, window_bounds = array<i64: 5, 128>}, {transform_indices = @transform_3, window_bounds = array<i64: 2, 128>}, {transform_indices = @transform_4, window_bounds = array<i64: 1, 128>}, {transform_indices = @transform_5, window_bounds = array<i64: 1, 128>}]} {
    %c0_i32 = arith.constant 0 : i32
    %0 = arith.cmpi eq, %arg1, %c0_i32 : i32
    %1 = arith.extui %0 : i1 to i32
    %c0_i32_0 = arith.constant 0 : i32
    %2 = arith.cmpi ne, %1, %c0_i32_0 : i32
    scf.if %2 {
      %cst_10 = arith.constant 0.000000e+00 : f32
      %16 = vector.broadcast %cst_10 : f32 to vector<2x256xf32>
      %c0_11 = arith.constant 0 : index
      %c0_12 = arith.constant 0 : index
      %17 = vector.load %arg8[%c0_11, %c0_12] : memref<2x256xf32, #tpu.memory_space<vmem>>, vector<2x256xf32>
      tpu.vector_store %arg8[%c0_11, %c0_12], %16 {strides = array<i32>} : memref<2x256xf32, #tpu.memory_space<vmem>>, vector<2x256xf32>,
    } else {
    }
    %c128_i32 = arith.constant 128 : i32
    %3 = arith.muli %arg1, %c128_i32 : i32
    %4 = tpu.assume_multiple %3, 128 : i32
    %c0 = arith.constant 0 : index
    %5 = arith.index_cast %4 : i32 to index
    %6 = vector.load %arg2[%c0, %5] : memref<2x512xbf16, #tpu.memory_space<vmem>>, vector<2x128xbf16>
    %c0_1 = arith.constant 0 : index
    %c0_2 = arith.constant 0 : index
    %7 = vector.load %arg8[%c0_1, %c0_2] : memref<2x256xf32, #tpu.memory_space<vmem>>, vector<2x256xf32>
    %c0_3 = arith.constant 0 : index
    %c0_4 = arith.constant 0 : index
    %c0_5 = arith.constant 0 : index
    %c0_6 = arith.constant 0 : index
    %8 = vector.load %arg3[%c0_3, %c0_4, %c0_5, %c0_6] : memref<1x1x128x256xbf16, #tpu.memory_space<vmem>>, vector<1x1x128x256xbf16>
    %9 = vector.shape_cast %8 : vector<1x1x128x256xbf16> to vector<128x256xbf16>
    %cst = arith.constant dense<0.000000e+00> : vector<2x256xf32>
    %10 = tpu.matmul %6, %9, %cst {dimension_numbers = #tpu.dot_dimension_numbers<[1], [0], [0], [1], [0, 0, 1, 1], [], []>} : vector<2x128xbf16>, vector<128x256xbf16>, vector<2x256xf32> -> vector<2x256xf32>
    %11 = arith.addf %7, %10 : vector<2x256xf32>
    %c0_7 = arith.constant 0 : index
    %c0_8 = arith.constant 0 : index
    %12 = vector.load %arg8[%c0_7, %c0_8] : memref<2x256xf32, #tpu.memory_space<vmem>>, vector<2x256xf32>
    tpu.vector_store %arg8[%c0_7, %c0_8], %11 {strides = array<i32>} : memref<2x256xf32, #tpu.memory_space<vmem>>, vector<2x256xf32>,
    %c3_i32 = arith.constant 3 : i32
    %13 = arith.cmpi eq, %arg1, %c3_i32 : i32
    %14 = arith.extui %13 : i1 to i32
    %c0_i32_9 = arith.constant 0 : i32
    %15 = arith.cmpi ne, %14, %c0_i32_9 : i32
    scf.if %15 {
      %c0_10 = arith.constant 0 : index
      %c0_11 = arith.constant 0 : index
      %16 = vector.load %arg8[%c0_10, %c0_11] : memref<2x256xf32, #tpu.memory_space<vmem>>, vector<2x256xf32>
      %c0_12 = arith.constant 0 : index
      %c0_13 = arith.constant 0 : index
      %17 = vector.load %arg4[%c0_12, %c0_13] : memref<5x128xf32, #tpu.memory_space<vmem>>, vector<5x128xf32>
      %18 = vector.extract_strided_slice %17 {offsets = [0, 0], sizes = [1, 128], strides = [1, 1]} : vector<5x128xf32> to vector<1x128xf32>
      %19 = vector.extract_strided_slice %17 {offsets = [1, 0], sizes = [1, 128], strides = [1, 1]} : vector<5x128xf32> to vector<1x128xf32>
      %20 = vector.extract_strided_slice %17 {offsets = [2, 0], sizes = [1, 128], strides = [1, 1]} : vector<5x128xf32> to vector<1x128xf32>
      %21 = vector.extract_strided_slice %17 {offsets = [3, 0], sizes = [1, 128], strides = [1, 1]} : vector<5x128xf32> to vector<1x128xf32>
      %22 = vector.extract_strided_slice %17 {offsets = [4, 0], sizes = [1, 128], strides = [1, 1]} : vector<5x128xf32> to vector<1x128xf32>
      %23 = vector.extract_strided_slice %16 {offsets = [0, 0], sizes = [2, 128], strides = [1, 1]} : vector<2x256xf32> to vector<2x128xf32>
      %24 = vector.broadcast %18 : vector<1x128xf32> to vector<2x128xf32>
      %25 = arith.addf %23, %24 : vector<2x128xf32>
      %26 = vector.extract_strided_slice %16 {offsets = [0, 128], sizes = [2, 128], strides = [1, 1]} : vector<2x256xf32> to vector<2x128xf32>
      %27 = vector.broadcast %19 : vector<1x128xf32> to vector<2x128xf32>
      %28 = arith.addf %26, %27 : vector<2x128xf32>
      %29 = math.exp %28 : vector<2x128xf32>
      %30 = vector.broadcast %20 : vector<1x128xf32> to vector<2x128xf32>
      %31 = arith.mulf %30, %25 : vector<2x128xf32>
      %32 = vector.broadcast %21 : vector<1x128xf32> to vector<2x128xf32>
      %33 = arith.addf %31, %32 : vector<2x128xf32>
      %c0_14 = arith.constant 0 : index
      %c0_15 = arith.constant 0 : index
      %34 = vector.load %arg5[%c0_14, %c0_15] : memref<2x128xf32, #tpu.memory_space<vmem>>, vector<2x128xf32>
      %35 = arith.mulf %29, %34 : vector<2x128xf32>
      %36 = arith.addf %33, %35 : vector<2x128xf32>
      %37 = arith.mulf %29, %29 : vector<2x128xf32>
      %38 = arith.mulf %33, %33 : vector<2x128xf32>
      %39 = arith.addf %37, %38 : vector<2x128xf32>
      %40 = arith.subf %39, %28 : vector<2x128xf32>
      %cst_16 = arith.constant 5.000000e-01 : f32
      %41 = vector.broadcast %cst_16 : f32 to vector<2x128xf32>
      %42 = arith.subf %40, %41 : vector<2x128xf32>
      %43 = vector.broadcast %22 : vector<1x128xf32> to vector<2x128xf32>
      %44 = arith.mulf %43, %42 : vector<2x128xf32>
      %45 = vector.shape_cast %44 : vector<2x128xf32> to vector<1x2x128xf32>
      %cst_17 = arith.constant dense<0.000000e+00> : vector<1xf32>
      %46 = vector.multi_reduction <add>, %45, %cst_17 [1, 2] : vector<1x2x128xf32> to vector<1xf32>
      %47 = vector.shape_cast %46 : vector<1xf32> to vector<1x1x1xf32>
      %48 = vector.extract %47[0, 0, 0] : f32 from vector<1x1x1xf32>
      %49 = vector.broadcast %22 : vector<1x128xf32> to vector<2x128xf32>
      %50 = arith.mulf %49, %36 : vector<2x128xf32>
      %51 = vector.shape_cast %50 : vector<2x128xf32> to vector<1x2x128xf32>
      %cst_18 = arith.constant dense<0.000000e+00> : vector<1xf32>
      %52 = vector.multi_reduction <add>, %51, %cst_18 [1, 2] : vector<1x2x128xf32> to vector<1xf32>
      %53 = vector.shape_cast %52 : vector<1xf32> to vector<1x1x1xf32>
      %54 = vector.extract %53[0, 0, 0] : f32 from vector<1x1x1xf32>
      %55 = vector.broadcast %54 : f32 to vector<1x128xf32>
      %c0_19 = arith.constant 0 : index
      %c0_20 = arith.constant 0 : index
      %56 = vector.load %arg6[%c0_19, %c0_20] : memref<1x128xf32, #tpu.memory_space<vmem>>, vector<1x128xf32>
      tpu.vector_store %arg6[%c0_19, %c0_20], %55 {strides = array<i32>} : memref<1x128xf32, #tpu.memory_space<vmem>>, vector<1x128xf32>,
      %57 = vector.broadcast %48 : f32 to vector<1x128xf32>
      %c0_21 = arith.constant 0 : index
      %c0_22 = arith.constant 0 : index
      %58 = vector.load %arg7[%c0_21, %c0_22] : memref<1x128xf32, #tpu.memory_space<vmem>>, vector<1x128xf32>
      tpu.vector_store %arg7[%c0_21, %c0_22], %57 {strides = array<i32>} : memref<1x128xf32, #tpu.memory_space<vmem>>, vector<1x128xf32>,
    } else {
    }
    return
  }
  func.func @transform_0(%arg0: i32, %arg1: i32) -> (i32, i32) {
    %c0_i32 = arith.constant 0 : i32
    %c0_i32_0 = arith.constant 0 : i32
    %c0_i32_1 = arith.constant 0 : i32
    return %c0_i32, %c0_i32_0 : i32, i32
  }
  func.func @transform_1(%arg0: i32, %arg1: i32) -> (i32, i32, i32, i32) {
    %c0_i32 = arith.constant 0 : i32
    %c0_i32_0 = arith.constant 0 : i32
    %c0_i32_1 = arith.constant 0 : i32
    return %arg0, %arg1, %c0_i32, %c0_i32_0 : i32, i32, i32, i32
  }
  func.func @transform_2(%arg0: i32, %arg1: i32) -> (i32, i32) {
    %c0_i32 = arith.constant 0 : i32
    %c0_i32_0 = arith.constant 0 : i32
    return %c0_i32, %arg0 : i32, i32
  }
  func.func @transform_3(%arg0: i32, %arg1: i32) -> (i32, i32) {
    %c0_i32 = arith.constant 0 : i32
    %c0_i32_0 = arith.constant 0 : i32
    return %c0_i32, %arg0 : i32, i32
  }
  func.func @transform_4(%arg0: i32, %arg1: i32) -> (i32, i32) {
    %c0_i32 = arith.constant 0 : i32
    %c0_i32_0 = arith.constant 0 : i32
    return %c0_i32, %arg0 : i32, i32
  }
  func.func @transform_5(%arg0: i32, %arg1: i32) -> (i32, i32) {
    %c0_i32 = arith.constant 0 : i32
    %c0_i32_0 = arith.constant 0 : i32
    return %c0_i32, %arg0 : i32, i32
  }
}

</mosaic_0001>

<bundles_post_ra>
// kernel: tpu_custom_call.1
= control target key start
LH: loop header
LB: loop body
LE: loop exit
PB: predicated region body
PF: predicated region fallthrough
CT: control target
= control target key end

     0   :  { %s1566_s0 = inlined_call_operand.hbm [shape: bf16[2,512], index: 0, kind: input, shape index: {}]   ;;  %s1567_s1 = inlined_call_operand.hbm [shape: bf16[2,4,128,256], index: 1, kind: input, shape index: {}]   ;;  %s1568_s2 = inlined_call_operand.hbm [shape: f32[5,256], index: 2, kind: input, shape index: {}]   ;;  %s1569_s3 = inlined_call_operand.vmem [shape: f32[2,256], index: 3, kind: input, shape index: {}]   ;;  %s1570_s4 = inlined_call_operand.hbm [shape: f32[1,256], index: 4, kind: output, shape index: {0}]   ;;  %s1571_s5 = inlined_call_operand.hbm [shape: f32[1,256], index: 5, kind: output, shape index: {1}]  }
   0x1   :  { %1582 = sst [smem:[#allocation20_spill]] %s1566_s0 }
   0x2   :  { %1583 = sst [smem:[#allocation21_spill]] %s1567_s1 }
   0x3   :  { %1584 = sst [smem:[#allocation22_spill]] %s1569_s3 }
   0x4   :  { %1585 = sst [smem:[#allocation23_spill]] %s1570_s4 }
   0x5   :  { %1586 = sst [smem:[#allocation24_spill]] %s1571_s5 }
   0x6   :  { %11 = vsyncpa [#allocation4], 0 }
   0x7   :  { %12 = vsyncpa [#allocation7], 0 }
   0x8   :  { %14 = vsyncpa [#allocation7 + $0x1], 0 }
   0x9   :  { %15 = vsyncpa [#allocation5], 0 }
   0xa   :  { %17 = vsyncpa [#allocation5 + $0x1], 0 }
   0xb   :  { %18 = vsyncpa [#allocation11], 0 }
   0xc   :  { %20 = vsyncpa [#allocation11 + $0x1], 0  ;;  %s1227_s18 = smov 0   ;;  %s1229_s19 = smov 0  }
   0xd   :  { %s1231_s20 = smov 0   ;;  %s1233_s21 = smov 0  }
   0xe   :  { %s1235_s22 = smov 0   ;;  %s1237_s23 = smov 0  }
   0xf   :  { %s1239_s24 = smov 0   ;;  %s1241_s25 = smov 0  }
  0x10   :  { %s1243_s26 = smov 0   ;;  %s1245_s27 = smov 0  }
  0x11   :  { %s1247_s28 = smov 0  }
  0x12 LB: > { %1587 = sst [smem:[#allocation17_spill]] %s1169_s24  ;;  %s35_s29 = sadd.s32 1, %s1177_s26  ;;  %s1185_s28 = sphi %s1247_s28, %s26_s28   ;;  %s1181_s27 = sphi %s1245_s27, %s1626_s27   ;;  %s1177_s26 = sphi %s1243_s26, %s1625_s26   ;;  %s1173_s25 = sphi %s1241_s25, %s1624_s25   ;;  %s1169_s24 = sphi %s1239_s24, %s1623_s24   ;;  %s1165_s23 = sphi %s1237_s23, %s1622_s23   ;;  %s1161_s22 = sphi %s1235_s22, %s1621_s22   ;;  %s1157_s21 = sphi %s1233_s21, %s1620_s21   ;;  %s1153_s20 = sphi %s1231_s20, %s1619_s20   ;;  %s1149_s19 = sphi %s1229_s19, %s1618_s19   ;;  %s1145_s18 = sphi %s1227_s18, %s1617_s18  }
  0x13   : > { %s38_s30 = sadd.s32 1, %s1181_s27  ;;  %p36_p0 = scmp.ge.s32.totalorder %s35_s29, 4 }
  0x14   : > { %s68_s6 = sadd.s32 1, %s1165_s23  ;;  %p75_p1 = scmp.ne.s32.totalorder %s1165_s23, %s1161_s22 }
  0x15   : > { %p76_p2 = scmp.eq.s32.totalorder %s1185_s28, 0  ;;  %s1628_s29 = smov (%p36_p0, %s35_s29), 0 }
  0x16   : > { %1588 = sst [smem:[#allocation18_spill]] %s1628_s29  ;;  %s1630_s30 = smov (!%p36_p0, %s38_s30), %s1181_s27 }
  0x17   : > { %s64_s7 = ssub.s32 %s1177_s26, %s1628_s29  ;;  %p1295_p3 = por %p76_p2, %p75_p1 }
  0x18   : > { %p40_p4 = scmp.ge.s32.totalorder %s1630_s30, 2  ;;  %p1578_p5 = scmp.lt.s32.totalorder %s1185_s28, 8 }
  0x19   : > { %s220_s9 = sand.u32 1, %s1185_s28   ;;  %s222_s10 = sand.u32 1, %s1165_s23  }
  0x1a   : > { %s1632_s30 = smov (%p40_p4, %s1630_s30), 0  ;;  %s752_s12 = sshll.u32 %s222_s10, 7 }
  0x1b   : > { %1590 = sst [smem:[#allocation19_spill]] %s1632_s30  ;;  %s1306_s11 = ssub.s32 %s1181_s27, %s1632_s30 }
  0x1c   : > { %s65_s13 = sor.u32 %s64_s7, %s1306_s11  ;;  %p92_p6 = scmp.eq.s32.totalorder %s1306_s11, 0 }
  0x1d   : > { %p66_p7 = scmp.eq.s32.totalorder %s65_s13, 0  ;;  %s753_s14 = sshll.u32 %s1177_s26, 5 }
  0x1e   : > { %s754_s15 = sshll.u32 %s1181_s27, 7  ;;  %s224_s29 = scalar_lea.vmem [#allocation6], %s752_s12 }
  0x1f   : > { %s1313_s16 = scalar_select %p66_p7, %s1165_s23, %s68_s6  }
  0x20   : > { %s230_s17 = sadd.s32 %s754_s15, %s753_s14  ;;  %s233_s5 = sshll.u32 %s224_s29, 4  ;;  %s234_s5 = int_to_ptr.vmem [resolvable:$true] %s233_s5 }
  0x21   : > { %s755_s4 = sshll.u32 %s230_s17, 6  ;;  %s1591_s1 = sld [smem:[#allocation21_spill]] }
  0x22   : > { %p1324_p8 = pnand %p1578_p5, %p1295_p3  ;;  %s1328_s10 = scalar_lea.sflag [#allocation7], %s220_s9 }
  0x23   : > { %s958_s6 = scalar_lea.vmem %s234_s5, 2048  ;;  %s1187_s29 = smov [#allocation6]  }
  0x24   : > { %p947_p9 = pneg %p1324_p8  ;;  %p959_p10 = scmp.ne.s32.totalorder %s234_s5, %s958_s6 }
  0x25   : > { %s963_s12 = sshll.u32 %s1187_s29, 4  ;;  %s964_s12 = int_to_ptr.vmem [resolvable:$false] %s963_s12 }
  0x26   : > { %p961_p11 = pnand %p959_p10, %p947_p9  ;;  %s965_s3 = scalar_lea.vmem %s964_s12, 4096 }
  0x27   : > { %s232_s30 = scalar_lea.hbm %s1591_s1, %s755_s4  ;;  %p966_p13 = scmp.lt.s32.totalorder %s234_s5, %s964_s12 }
  0x28   : > { %p962_p12 = pneg %p961_p11  ;;  %p967_p0 = scmp.lt.s32.totalorder %s965_s3, %s958_s6 }
  0x2a   : > { %p968_p1 = por %p967_p0, %p966_p13 }
  0x2c   : > { %p969_p3 = pnand %p968_p1, %p962_p12 }
  0x2e   : > { %972 = shalt.err (!%p969_p3)
}
  0x2f   : > { %s1188_s4 = smov 128   ;;  %s1189_s24 = smov 8  }
  0x30   : > { %810 = dma.hbm_to_vmem [thread:$0]  (!%p1324_p8), %s232_s30, 2048, %s234_s5, %s1328_s10, %s1188_s4, %s1188_s4, %s1189_s24  }
  0x31   : > { %s1336_s8 = sadd.s32 4294967295, %s1185_s28   ;;  %s748_s9 = sadd.s32 4294967294, %s1185_s28  }
  0x32   : > { %p81_p4 = scmp.ne.s32.totalorder %s1161_s22, %s1157_s21  ;;  %p1577_p7 = scmp.eq.s32.totalorder %s1336_s8, 0 }
  0x33   : > { %p107_p9 = scmp.ne.s32.totalorder %s1149_s19, %s1145_s18  ;;  %p163_p11 = scmp.eq.s32.totalorder %s748_s9, 7 }
  0x34   : > { %p1347_p8 = por %p1577_p7, %p81_p4  ;;  %p749_p0 = scmp.ge.s32.totalorder %s1185_s28, 1 }
  0x35   : > { %p1353_p12 = por %p107_p9, %p1577_p7  ;;  %p1357_p13 = por %p163_p11, %p107_p9 }
  0x36   : > { %p196_p1 = scmp.lt.s32.totalorder %s1185_s28, 9  ;;  %s1190_s14 = smov [#allocation3]  }
  0x37   : > { %s1594_s21 = scalar_select %p1353_p12, 1, 0 }
  0x38   : > { %s1595_s30 = scalar_select %p1357_p13, 1, 0 }
  0x39   : > { %p1363_p3 = pnand %p749_p0, %p196_p1  ;;  %s209_s17 = sshll.u32 %s1190_s14, 4  ;;  %s210_s17 = int_to_ptr.vmem [resolvable:$true] %s209_s17 }
  0x3a   : > { %s94_s7 = sadd.s32 1, %s1153_s20  ;;  %p101_p11 = scmp.ne.s32.totalorder %s1153_s20, %s1149_s19 }
  0x3b   : > { %p803_p4 = pneg %p1363_p3  ;;  %s245_s12 = sand.u32 1, %s1153_s20  }
  0x3c   : > { %s1373_s6 = scalar_select %p92_p6, %s1153_s20, %s94_s7  }
  0x3d   : > { %p1377_p9 = pnand %p803_p4, %p1577_p7  ;;  %s1389_s24 = scalar_lea.hbm %s1568_s2, %s754_s15 }
  0x3e   : > { %p1396_p0 = por %p101_p11, %p76_p2  ;;  %s984_s9 = scalar_lea.vmem %s210_s17, 64 }
  0x3f   : > { %p975_p6 = pneg %p1377_p9  ;;  %p985_p1 = scmp.ne.s32.totalorder %s210_s17, %s984_s9 }
  0x40   : > { %p992_p5 = scmp.lt.s32.totalorder %s210_s17, %s210_s17  ;;  %p993_p10 = scmp.lt.s32.totalorder %s984_s9, %s984_s9 }
  0x41   : > { %p987_p4 = pnand %p985_p1, %p975_p6 }
  0x42   : > { %p994_p13 = por %p993_p10, %p992_p5 }
  0x43   : > { %p988_p7 = pneg %p987_p4 }
  0x45   : > { %p995_p12 = pnand %p994_p13, %p988_p7 }
  0x47   : > { %998 = shalt.err (!%p995_p12)
}
  0x48   : > { %s1599_s0 = sld [smem:[#allocation20_spill]]  ;;  %p1600_p2 = scmp.eq.s32.totalorder %s1336_s8, 7 }
  0x49   : > { %s756_s3 = sshll.u32 %s245_s12, 3  ;;  %p1602_p5 = scmp.lt.s32.totalorder %s1185_s28, 8 }
  0x4a   : > { %p1412_p6 = por %p1600_p2, %p101_p11  ;;  %s247_s4 = scalar_lea.vmem [#allocation8], %s756_s3 }
  0x4b   : > { %p1420_p7 = pnand %p1602_p5, %p1396_p0  ;;  %s254_s9 = sshll.u32 %s247_s4, 4  ;;  %s255_s9 = int_to_ptr.vmem [resolvable:$true] %s254_s9 }
  0x4c   : > { %s1191_s15 = smov [#allocation8]  }
  0x4d   : > { %p1001_p10 = pneg %p1420_p7  ;;  %s1017_s14 = sshll.u32 %s1191_s15, 4  ;;  %s1018_s14 = int_to_ptr.vmem [resolvable:$false] %s1017_s14 }
  0x4e   : > { %806 = dma.hbm_to_vmem [thread:$0]  (!%p1377_p9), %s1599_s0, 64, %s210_s17, [#allocation4]  }
  0x4f   : > { %s1012_s17 = scalar_lea.vmem %s255_s9, 128  ;;  %s1019_s12 = scalar_lea.vmem %s1018_s14, 256 }
  0x50   : > { %p1013_p12 = scmp.ne.s32.totalorder %s255_s9, %s1012_s17  ;;  %p1020_p11 = scmp.lt.s32.totalorder %s255_s9, %s1018_s14 }
  0x51   : > { %p1021_p1 = scmp.lt.s32.totalorder %s1019_s12, %s1012_s17 }
  0x52   : > { %p1015_p13 = pnand %p1013_p12, %p1001_p10 }
  0x53   : > { %p1022_p0 = por %p1021_p1, %p1020_p11 }
  0x54   : > { %p1016_p9 = pneg %p1015_p13 }
  0x56   : > { %p1023_p4 = pnand %p1022_p0, %p1016_p9 }
  0x58   : > { %1026 = shalt.err (!%p1023_p4)
}
  0x59   : > { %813 = dma.hbm_to_vmem [thread:$0]  (!%p1420_p7), %s1389_s24, 128, %s255_s9, %s1328_s10  }
  0x5a   : > { %270 = sbr.rel (%p1363_p3) target bundleno = 648 (0x288), region = 36  ;;  %p1604_p2 = scmp.eq.s32.totalorder (!%p1363_p3), %s1336_s8, 0 }
  0x5f   : > { %1124 = dma.done.wait (%p1604_p2), [#allocation4], 64   ;;  %p1605_p5 = pmov %p1604_p2 }
  0x60   : > { %s276_s11 = sand.u32 1, %s1336_s8   ;;  %s278_s3 = sand.u32 1, %s1161_s22  }
  0x61   : > { %1126 = vsyncadd (%p1605_p5), [#allocation4], 4294967232  ;;  %s760_s4 = sshll.u32 %s278_s3, 7  ;;  %s277_s17 = scalar_lea.sflag [#allocation7], %s276_s11 }
  0x62   : > { %s1438_s29 = scalar_lea.vmem [#allocation6], %s760_s4 }
  0x63   : > { %1128 = dma.done.wait (%p1347_p8), %s277_s17, 2048  }
  0x64   : > { %1130 = vsyncadd (%p1347_p8), %s277_s17, 4294965248  ;;  %s1445_s10 = sand.u32 1, %s1149_s19   ;;  %p1606_p3 = scmp.ne.s32.totalorder %s1594_s21, 0 }
  0x65   : > { %s761_s13 = sshll.u32 %s1445_s10, 3 }
  0x66   : > { %s1448_s24 = scalar_lea.vmem [#allocation8], %s761_s13 }
  0x67   : > { %1132 = dma.done.wait (%p1606_p3), %s277_s17, 128  }
  0x68   : > { %1134 = vsyncadd (%p1606_p3), %s277_s17, 4294967168  ;;  %p328_p7 = scmp.lt.s32.totalorder %s1173_s25, 1  ;;  %s1607_s14 = sld [smem:[#allocation22_spill]] }
  0x69   : > { %s321_s11 = scalar_lea.vmem [#allocation9], %s1445_s10  ;;  %s1580_s3 = scalar_lea.vmem [#allocation10], %s1445_s10 }
  0x6a   : > { %s329_s8 = scalar_select %p328_p7, %s1173_s25, 1 }
  0x6b   : > { %s1608_s4 = sld [smem:[#allocation17_spill]] }
  0x6c   : > { %s762_s5 = sshll.u32 %s329_s8, 1 }
  0x6e   : > { %s1459_s12 = scalar_lea.vmem %s1607_s14, %s762_s5 }
  0x71   : > { %p763_p8 = scmp.ne.s32.totalorder %s1608_s4, 0 }
  0x73   : > { %336 = sbr.rel (%p763_p8) target bundleno = 122 (0x7a), region = 52 }
  0x78   : > { %v1192_v0 = vmov 0.0  }
  0x79   : > { %337 = vst [vmem:[#allocation2] sm:$0xf] %v1192_v0 }
  0x7a PF: > { %v919_v1 = vld [vmem:[%s1438_s29 + $0x74] ss:$8 sps:$4 sm:$0xff]   ;;  %v921_v2 = vld [vmem:[%s1438_s29 + $0x70] ss:$8 sps:$4 sm:$0xff]   ;;  %v1193_v3 = vmov 0   ;;  %s1609_s21 = sld [smem:[#allocation17_spill]]  ;;  %v487_v21 = vlaneseq }
  0x7b   : > { %472 = vmatprep.mubr.bf16.mxu0 %v1193_v3  ;;  %440 = vmatprep.subr.bf16.mxu0 %v919_v1  ;;  %v922_v4 = vld [vmem:[%s1438_s29 + $0x64] ss:$8 sps:$4 sm:$0xff]   ;;  %v924_v5 = vld [vmem:[%s1438_s29 + $0x60] ss:$8 sps:$4 sm:$0xff]   ;;  %v925_v6 = vld [vmem:[%s1438_s29 + $0x54] ss:$8 sps:$4 sm:$0xff]  }
  0x7c   : > { %441 = vmatpush1.bf16.msra.mxu0 %v921_v2  ;;  %v927_v7 = vld [vmem:[%s1438_s29 + $0x50] ss:$8 sps:$4 sm:$0xff]   ;;  %v928_v8 = vld [vmem:[%s1438_s29 + $0x44] ss:$8 sps:$4 sm:$0xff]   ;;  %v930_v9 = vld [vmem:[%s1438_s29 + $0x40] ss:$8 sps:$4 sm:$0xff]  }
  0x7d   : > { %442 = vmatprep.subr.bf16.mxu0 %v922_v4  ;;  %v931_v10 = vld [vmem:[%s1438_s29 + $0x34] ss:$8 sps:$4 sm:$0xff]   ;;  %v933_v11 = vld [vmem:[%s1438_s29 + $0x30] ss:$8 sps:$4 sm:$0xff]   ;;  %v934_v12 = vld [vmem:[%s1438_s29 + $0x24] ss:$8 sps:$4 sm:$0xff]  }
  0x7e   : > { %v936_v13 = vld [vmem:[%s1438_s29 + $0x20] ss:$8 sps:$4 sm:$0xff]   ;;  %v937_v14 = vld [vmem:[%s1438_s29 + $0x14] ss:$8 sps:$4 sm:$0xff]   ;;  %v939_v15 = vld [vmem:[%s1438_s29 + $0x10] ss:$8 sps:$4 sm:$0xff]  }
  0x7f   : > { %v940_v16 = vld [vmem:[%s1438_s29 + $0x4] ss:$8 sps:$4 sm:$0xff]   ;;  %v942_v17 = vld [vmem:[%s1438_s29] ss:$8 sps:$4 sm:$0xff]   ;;  %v1194_v19 = vmov 1983009808  }
  0x80   : > { %443 = vmatpush1.bf16.msra.mxu0 %v924_v5  ;;  %s764_s17 = sshll.u32 %s1609_s21, 7  ;;  %v485_v20 = vunpack.c.l.s4 %v1194_v19  ;;  %v488_v23 = vshrl.u32 %v487_v21, 7  ;;  %v343_v28 = vld [vmem:[#allocation2] sm:$0xf]  ;;  %p781_p10 = scmp.ne.s32.totalorder %s1609_s21, 3 }
  0x81   : > { %444 = vmatprep.subr.bf16.mxu0 %v925_v6  ;;  %s339_s13 = sshra.s32 %s764_s17, 7 }
  0x82   : > { %s341_s8 = scalar_lea.vmem [#allocation3], %s339_s13  ;;  %v486_v22 = vunpack.c.0.s8 %v485_v20 }
  0x83   : > { %v342_v18 = vld [vmem:[%s341_s8] sm:$0x1] }
  0x84   : > { %445 = vmatpush1.bf16.msra.mxu0 %v927_v7  ;;  %v489_v25 = vsub.s32 %v486_v22, %v488_v23 }
  0x85   : > { %446 = vmatprep.subr.bf16.mxu0 %v928_v8 }
  0x88   : > { %447 = vmatpush1.bf16.msra.mxu0 %v930_v9 }
  0x89   : > { %448 = vmatprep.subr.bf16.mxu0 %v931_v10 }
  0x8c   : > { %449 = vmatpush1.bf16.msra.mxu0 %v933_v11 }
  0x8d   : > { %450 = vmatprep.subr.bf16.mxu0 %v934_v12 }
  0x90   : > { %451 = vmatpush1.bf16.msra.mxu0 %v936_v13 }
  0x91   : > { %452 = vmatprep.subr.bf16.mxu0 %v937_v14 }
  0x94   : > { %453 = vmatpush1.bf16.msra.mxu0 %v939_v15 }
  0x95   : > { %454 = vmatprep.subr.bf16.mxu0 %v940_v16 }
  0x98   : > { %455 = vmatpush1.bf16.msra.mxu0 %v942_v17 }
  0x9b   : > { %473 = vmatmul.mubr.bf16.vlgmr.msra.gmra.mxu0 %v342_v18 }
 0x15b   : > { %v474_v24 = vpop.f32.mrf.mxu0 }
 0x15d   : > { %v476_v26 = vpop.f32.mrf.mxu0 }
 0x15e   : > { %v483_v27 = vcombine.low %v474_v24, %v476_v26 }
 0x15f   : > { %v478_v29 = vpop.f32.mrf.mxu0 }
 0x160   : > { %v490_v30 = vrot.slane %v483_v27, %v489_v25  ;;  %497 = sbr.rel (%p781_p10) target bundleno = 601 (0x259), region = 56 }
 0x161   : > { %v479_v31 = vpop.f32.mrf.mxu0 }
 0x162   : > { %v492_v32 = vadd.f32 %v490_v30, %v343_v28 }
 0x164   : > { %493 = vst [vmem:[#allocation2] sm:$0xf] %v492_v32 }
 0x165   : > { %v499_v34 = vld [vmem:[%s1448_s24] sm:$0x1f]  ;;  %v502_v35 = vsub.s32 0, %v488_v23  ;;  %v507_v36 = vsub.s32 1, %v488_v23  ;;  %v517_v41 = vsub.s32 2, %v488_v23  ;;  %v522_v45 = vsub.s32 3, %v488_v23 }
 0x166   : > { %v525_v49 = vld [vmem:[%s1459_s12] sm:$0x3]  ;;  %v535_v53 = vsub.s32 4, %v488_v23  ;;  %vm538_vm0 = vcmask 1041408  }
 0x167   : > { %v508_v38 = vrot.slane %v499_v34, %v507_v36  ;;  %v503_v39 = vrot.slane %v499_v34, %v502_v35  ;;  %v518_v44 = vrot.slane %v499_v34, %v517_v41  ;;  %v523_v47 = vrot.slane %v499_v34, %v522_v45 }
 0x168   : > { %v536_v57 = vrot.slane %v499_v34, %v535_v53 }
 0x16b   : > { %v498_v33 = vld [vmem:[#allocation2] sm:$0xf] }
 0x16c   : > { %v510_v37 = vrot.slane %v498_v33, 2  ;;  %v504_v43 = vadd.f32 %v503_v39, %v498_v33 }
 0x16e   : > { %v512_v40 = vadd.f32 %v510_v37, %v508_v38  ;;  %v519_v46 = vmul.f32 %v518_v44, %v504_v43 }
 0x170   : > { %v513_v42 = vmul.f32 1.442695, %v512_v40  ;;  %v524_v48 = vadd.f32 %v523_v47, %v519_v46 }
 0x172   : > { %943 = vpow2.f32 %v513_v42  ;;  %v529_v50 = vmul.f32 %v524_v48, %v524_v48 }
 0x17f   : > { %v944_v51 = vpop.eup %943 }
 0x180   : > { %v528_v52 = vmul.f32 %v944_v51, %v944_v51  ;;  %v526_v54 = vmul.f32 %v944_v51, %v525_v49 }
 0x182   : > { %v530_v55 = vadd.f32 %v529_v50, %v528_v52  ;;  %v527_v58 = vadd.f32 %v526_v54, %v524_v48 }
 0x184   : > { %v531_v56 = vsub.f32 %v530_v55, %v512_v40  ;;  %v549_v61 = vmul.f32 %v536_v57, %v527_v58 }
 0x186   : > { %v782_v59 = vadd.f32 -0.5, %v531_v56  ;;  %v550_v63 = vsel %vm538_vm0, %v549_v61, 0.0 }
 0x188   : > { %v537_v60 = vmul.f32 %v782_v59, %v536_v57 }
 0x18a   : > { %v539_v62 = vsel %vm538_vm0, %v537_v60, 0.0 }
 0x18b   : > { %540 = vadd.xlane.f32.xlu0 %v539_v62 }
 0x18f   : > { %551 = vadd.xlane.f32.xlu0 %v550_v63 }
 0x214   : > { %v541_v0 = vpop.xlane.xlu0 %540 }
 0x215   : > { %v542_v1 = vrot.slane %v541_v0, 4 }
 0x217   : > { %v543_v2 = vadd.f32 %v542_v1, %v541_v0 }
 0x218   : > { %v552_v3 = vpop.xlane.xlu0 %551 }
 0x219   : > { %v544_v4 = vrot.slane %v543_v2, 2  ;;  %v553_v5 = vrot.slane %v552_v3, 4 }
 0x21b   : > { %v554_v6 = vadd.f32 %v553_v5, %v552_v3  ;;  %v545_v7 = vadd.f32 %v544_v4, %v543_v2 }
 0x21d   : > { %v555_v8 = vrot.slane %v554_v6, 2  ;;  %v546_v9 = vrot.slane %v545_v7, 1 }
 0x21f   : > { %v556_v10 = vadd.f32 %v555_v8, %v554_v6  ;;  %v547_v11 = vadd.f32 %v546_v9, %v545_v7 }
 0x221   : > { %787 = vpush %v547_v11  ;;  %v557_v12 = vrot.slane %v556_v10, 1 }
 0x223   : > { %v558_v13 = vadd.f32 %v557_v12, %v556_v10 }
 0x225   : > { %789 = vpush %v558_v13 }
 0x252   : > { %s788_s29 = spop %787 }
 0x253   : > { %v562_v14 = vstv %s788_s29 }
 0x254   : > { %563 = vst [vmem:[%s1580_s3] sm:$0x1] %v562_v14 }
 0x256   : > { %s790_s24 = spop %789 }
 0x257   : > { %v560_v15 = vstv %s790_s24 }
 0x258   : > { %561 = vst [vmem:[%s321_s11] sm:$0x1] %v560_v15 }
 0x259 PF: > { %s1581_s5 = sshll.u32 %s1173_s25, 4  ;;  %s1610_s14 = sld [smem:[#allocation23_spill]] }
 0x25a   : > { %s581_s4 = sshll.u32 %s321_s11, 4  ;;  %s565_s21 = scalar_lea.sflag [#allocation5], %s1445_s10  ;;  %s582_s4 = int_to_ptr.vmem [resolvable:$true] %s581_s4 }
 0x25b   : > { %s1027_s17 = scalar_lea.vmem %s582_s4, 16  ;;  %s1195_s13 = smov [#allocation9]  }
 0x25c   : > { %p1028_p12 = scmp.ne.s32.totalorder %s582_s4, %s1027_s17  ;;  %s1031_s8 = sshll.u32 %s1195_s13, 4  ;;  %s1032_s8 = int_to_ptr.vmem [resolvable:$false] %s1031_s8 }
 0x25d   : > { %s1033_s29 = scalar_lea.vmem %s1032_s8, 32  ;;  %p1034_p11 = scmp.lt.s32.totalorder %s582_s4, %s1032_s8 }
 0x25e   : > { %p1029_p13 = pnand %p1028_p12, %p1412_p6  ;;  %p1035_p1 = scmp.lt.s32.totalorder %s1033_s29, %s1027_s17 }
 0x25f   : > { %s579_s12 = scalar_lea.hbm %s1610_s14, %s1581_s5 }
 0x260   : > { %p1030_p9 = pneg %p1029_p13  ;;  %p1036_p0 = por %p1035_p1, %p1034_p11 }
 0x262   : > { %p1037_p4 = pnand %p1036_p0, %p1030_p9 }
 0x264   : > { %1040 = shalt.err (!%p1037_p4)
}
 0x265   : > { %s1041_s24 = scalar_lea.hbm %s579_s12, 16  ;;  %s1045_s15 = scalar_lea.hbm %s1610_s14, 32 }
 0x266   : > { %p1042_p2 = scmp.ne.s32.totalorder %s579_s12, %s1041_s24  ;;  %p1046_p7 = scmp.lt.s32.totalorder %s579_s12, %s1610_s14 }
 0x267   : > { %p1047_p8 = scmp.lt.s32.totalorder %s1045_s15, %s1041_s24 }
 0x268   : > { %p1043_p5 = pnand %p1042_p2, %p1412_p6 }
 0x269   : > { %p1048_p10 = por %p1047_p8, %p1046_p7 }
 0x26a   : > { %p1044_p3 = pneg %p1043_p5 }
 0x26c   : > { %p1049_p12 = pnand %p1048_p10, %p1044_p3 }
 0x26e   : > { %1052 = shalt.err (!%p1049_p12)
}
 0x26f   : > { %799 = dma.vmem_to_hbm [thread:$0]  (%p1412_p6), %s582_s4, 16, %s579_s12, %s565_s21  }
 0x270   : > { %s1611_s17 = sshll.u32 %s1173_s25, 4  ;;  %s1612_s29 = sld [smem:[#allocation24_spill]] }
 0x271   : > { %s1613_s9 = scalar_lea.vmem [#allocation10], %s1445_s10  ;;  %s569_s3 = scalar_lea.sflag [#allocation11], %s1445_s10 }
 0x272   : > { %s594_s0 = sshll.u32 %s1613_s9, 4  ;;  %s1196_s24 = smov [#allocation10]   ;;  %s595_s0 = int_to_ptr.vmem [resolvable:$true] %s594_s0 }
 0x273   : > { %s1053_s5 = scalar_lea.vmem %s595_s0, 16  ;;  %s1057_s15 = sshll.u32 %s1196_s24, 4  ;;  %s1058_s15 = int_to_ptr.vmem [resolvable:$false] %s1057_s15 }
 0x274   : > { %p1054_p13 = scmp.ne.s32.totalorder %s595_s0, %s1053_s5  ;;  %s1059_s1 = scalar_lea.vmem %s1058_s15, 32 }
 0x275   : > { %p1060_p1 = scmp.lt.s32.totalorder %s595_s0, %s1058_s15  ;;  %p1061_p0 = scmp.lt.s32.totalorder %s1059_s1, %s1053_s5 }
 0x276   : > { %s592_s11 = scalar_lea.hbm %s1612_s29, %s1611_s17  ;;  %p1055_p9 = pnand %p1054_p13, %p1412_p6 }
 0x277   : > { %p1062_p4 = por %p1061_p0, %p1060_p1 }
 0x278   : > { %p1056_p11 = pneg %p1055_p9 }
 0x27a   : > { %p1063_p2 = pnand %p1062_p4, %p1056_p11 }
 0x27c   : > { %1066 = shalt.err (!%p1063_p2)
}
 0x27d   : > { %s1067_s25 = scalar_lea.hbm %s592_s11, 16  ;;  %s1071_s4 = scalar_lea.hbm %s1612_s29, 32 }
 0x27e   : > { %p1068_p5 = scmp.ne.s32.totalorder %s592_s11, %s1067_s25  ;;  %p1072_p8 = scmp.lt.s32.totalorder %s592_s11, %s1612_s29 }
 0x27f   : > { %p1073_p10 = scmp.lt.s32.totalorder %s1071_s4, %s1067_s25 }
 0x280   : > { %p1069_p3 = pnand %p1068_p5, %p1412_p6 }
 0x281   : > { %p1074_p12 = por %p1073_p10, %p1072_p8 }
 0x282   : > { %p1070_p7 = pneg %p1069_p3 }
 0x284   : > { %p1075_p13 = pnand %p1074_p12, %p1070_p7 }
 0x286   : > { %1078 = shalt.err (!%p1075_p13)
}
 0x287   : > { %800 = dma.vmem_to_hbm [thread:$0]  (%p1412_p6), %s595_s0, 16, %s592_s11, %s569_s3  }
 0x288 PF: > { %p824_p9 = scmp.ge.s32.totalorder %s1185_s28, 2  ;;  %s606_s1 = sand.u32 1, %s1145_s18  }
 0x289   : > { %p1614_p11 = scmp.ne.s32.totalorder %s1595_s30, 0  ;;  %s607_s13 = scalar_lea.sflag [#allocation5], %s606_s1 }
 0x28b   : > { %p815_p1 = pnand %p824_p9, %p1614_p11 }
 0x28d   : > { %p816_p0 = pneg %p815_p1 }
 0x28f   : > { %1136 = dma.done.wait (%p816_p0), %s607_s13, 16  }
 0x290   : > { %1138 = vsyncadd (%p816_p0), %s607_s13, 4294967280  ;;  %s615_s8 = scalar_lea.sflag [#allocation11], %s606_s1 }
 0x291   : > { %1140 = dma.done.wait (%p816_p0), %s615_s8, 16  }
 0x292   : > { %1142 = vsyncadd (%p816_p0), %s615_s8, 4294967280  ;;  %s26_s28 = sadd.s32 1, %s1185_s28   ;;  %s1615_s0 = sld [smem:[#allocation18_spill]] }
 0x293   : > { %p23_p4 = scmp.ge.s32.totalorder %s26_s28, 10   ;;  %s1616_s30 = sld [smem:[#allocation19_spill]] }
 0x294   : > { %s1617_s18 = smov %s1149_s19  ;;  %s1618_s19 = smov %s1153_s20 }
 0x295   : > { %s1619_s20 = smov %s1373_s6  ;;  %s1620_s21 = smov %s1161_s22 }
 0x296   : > { %s1621_s22 = smov %s1165_s23  ;;  %s1622_s23 = smov %s1313_s16 }
 0x297   : > { %s1623_s24 = smov %s1177_s26  ;;  %s1624_s25 = smov %s1181_s27 }
 0x298   : > { %s1625_s26 = smov %s1615_s0  ;;  %25 = sbr.rel (!%p23_p4) target bundleno = 18 (0x12), region = 126 }
 0x299   : > { %s1626_s27 = smov %s1616_s30 }
 0x29d   :  { %619 = vsyncpa [#allocation4], 1 }
 0x29e   :  { %621 = vsyncpa [#allocation4 + $0x1], 1 }
 0x29f   :  { %622 = vsyncpa [#allocation7], 1 }
 0x2a0   :  { %624 = vsyncpa [#allocation7 + $0x1], 1 }
 0x2a1   :  { %625 = vsyncpa [#allocation5], 1 }
 0x2a2   :  { %627 = vsyncpa [#allocation5 + $0x1], 1 }
 0x2a3   :  { %628 = vsyncpa [#allocation11], 1 }
 0x2a4   :  { %630 = vsyncpa [#allocation11 + $0x1], 1 }

</bundles_post_ra>
